<compile_context>
chip_gen: v7x
topology: tpu7x:2x2x1
jax: 0.10.0
libtpu: 0.0.40
codegen_flags: <defaults>
</compile_context>

<pallas_src>
import functools

import jax
import jax.numpy as jnp
from jax import lax
from jax.experimental import pallas as pl
from jax.experimental.pallas import tpu as pltpu


# --------------------------------------------------------------------------- kernels


def _ntxent_dedup_kernel(k0_ref, k1_ref, out_ref, *, inv_t: float):
    """Single-block path (queries == keys): 3 matmuls, shared exp(l01).

    Rows of l10 are columns of l01 and l00/l11 are symmetric, so the second anchor
    half only needs column (axis=0) sums of the already-computed exp matrices:
    3*B^2 transcendentals, no 4th matmul, no transpose.  Only valid when |1/t| is
    small enough that exp(+-1/t) stays in f32 range (guarded in the wrapper).
    """
    f32 = jnp.float32
    inv_t = f32(inv_t)
    k0 = k0_ref[...]                                   # (B, Dp) normalized, mm dtype
    k1 = k1_ref[...]
    b = k0.shape[0]

    # Fold 1/t into the query-side operand: one (B, Dp) multiply instead of a (B, B)
    # multiply per similarity matrix.
    q0 = (k0.astype(f32) * inv_t).astype(k0.dtype)
    q1 = (k1.astype(f32) * inv_t).astype(k1.dtype)

    def sim(a, bm):
        # Contract dim 1 of both operands (A @ B^T) -> no materialized key transpose.
        return lax.dot_general(a, bm, (((1,), (1,)), ((), ())),
                               preferred_element_type=f32)

    l01 = sim(q0, k1)                                  # (B, B)
    l00 = sim(q0, k0)                                  # (B, B)
    l11 = sim(q1, k1)                                  # (B, B)

    rows = lax.broadcasted_iota(jnp.int32, (b, b), 0)
    cols = lax.broadcasted_iota(jnp.int32, (b, b), 1)
    diag = rows == cols

    # Positive logits = diag(l01); identical for both anchor halves, and exactly the
    # value that appears inside the logsumexp (no precision asymmetry).
    pos_sum = jnp.sum(jnp.where(diag, l01, 0.0), axis=(0, 1), keepdims=True)   # (1,1)

    # Logits bounded by |1/t| -> shift-free exp; exp(l01) computed ONCE and reused for
    # both anchor halves (row sums vs. column sums).
    e01 = jnp.exp(l01)
    e00 = jnp.where(diag, 0.0, jnp.exp(l00))
    e11 = jnp.where(diag, 0.0, jnp.exp(l11))

    z0 = jnp.sum(e01, axis=1, keepdims=True) + jnp.sum(e00, axis=1, keepdims=True)  # (B,1)
    z1 = jnp.sum(e01, axis=0, keepdims=True) + jnp.sum(e11, axis=0, keepdims=True)  # (1,B)

    lse_sum = (jnp.sum(jnp.log(z0), axis=(0, 1), keepdims=True)
               + jnp.sum(jnp.log(z1), axis=(0, 1), keepdims=True))                  # (1,1)

    out_ref[0] = lse_sum - 2.0 * pos_sum


def _ntxent_tiled_kernel(q0_ref, q1_ref, k0_ref, k1_ref, out_ref, *,
                         inv_t: float, use_max_shift: bool):
    """Row-tiled path: 4 matmuls of (TM, Dp) x (Dp, B) per anchor tile."""
    f32 = jnp.float32
    inv_t = f32(inv_t)
    k0 = k0_ref[...]                                   # (B, Dp) normalized keys
    k1 = k1_ref[...]
    q0 = (q0_ref[...].astype(f32) * inv_t).astype(k0.dtype)   # (TM, Dp), 1/t folded in
    q1 = (q1_ref[...].astype(f32) * inv_t).astype(k0.dtype)
    tm = q0.shape[0]
    b = k0.shape[0]

    def sim(a, bm):
        return lax.dot_general(a, bm, (((1,), (1,)), ((), ())),
                               preferred_element_type=f32)

    l01 = sim(q0, k1)                                  # (TM, B)
    l00 = sim(q0, k0)
    l10 = sim(q1, k0)
    l11 = sim(q1, k1)

    r0 = pl.program_id(0) * tm
    rows = lax.broadcasted_iota(jnp.int32, (tm, b), 0) + r0
    cols = lax.broadcasted_iota(jnp.int32, (tm, b), 1)
    diag = rows == cols

    pos_sum = jnp.sum(jnp.where(diag, l01, 0.0), axis=(0, 1), keepdims=True)   # (1,1)

    if use_max_shift:
        # Numerically safe fallback for extreme temperatures (|1/t| > ~60).
        m0 = jnp.maximum(jnp.max(l01, axis=1, keepdims=True),
                         jnp.max(l00, axis=1, keepdims=True))
        z0 = (jnp.sum(jnp.exp(l01 - m0), axis=1, keepdims=True)
              + jnp.sum(jnp.where(diag, 0.0, jnp.exp(l00 - m0)), axis=1, keepdims=True))
        lse0 = m0 + jnp.log(z0)
        m1 = jnp.maximum(jnp.max(l10, axis=1, keepdims=True),
                         jnp.max(l11, axis=1, keepdims=True))
        z1 = (jnp.sum(jnp.exp(l10 - m1), axis=1, keepdims=True)
              + jnp.sum(jnp.where(diag, 0.0, jnp.exp(l11 - m1)), axis=1, keepdims=True))
        lse1 = m1 + jnp.log(z1)
    else:
        # Logits bounded by |1/t| -> plain exp, no shift, no max reductions.
        z0 = (jnp.sum(jnp.exp(l01), axis=1, keepdims=True)
              + jnp.sum(jnp.where(diag, 0.0, jnp.exp(l00)), axis=1, keepdims=True))
        z1 = (jnp.sum(jnp.exp(l10), axis=1, keepdims=True)
              + jnp.sum(jnp.where(diag, 0.0, jnp.exp(l11)), axis=1, keepdims=True))
        lse0 = jnp.log(z0)
        lse1 = jnp.log(z1)

    out_ref[0] = (jnp.sum(lse0, axis=(0, 1), keepdims=True)
                  + jnp.sum(lse1, axis=(0, 1), keepdims=True)
                  - 2.0 * pos_sum)


# --------------------------------------------------------------- hardware-aware setup


def _device_kind() -> str:
    try:
        return jax.devices()[0].device_kind.lower()
    except Exception:
        return ""


def _vmem_capacity_bytes() -> int:
    try:
        cap = getattr(pltpu.get_tpu_info(), "vmem_capacity_bytes", None)
        if cap:
            return int(cap)
    except Exception:
        pass
    return (64 << 20) if "v7" in _device_kind() else (128 << 20)


def _num_tensorcores() -> int:
    # v7x exposes 2 TensorCores per chip; a "parallel" grid axis shards tiles across them.
    return 2 if "v7" in _device_kind() else 1


def _vmem_est_dedup(b, dp, mm_bytes):
    inputs = 2 * 2 * b * dp * mm_bytes       # two (B, Dp) inputs, double-buffered
    scaled = 2 * b * dp * mm_bytes           # 1/t-scaled query copies
    temps = 8 * b * b * 4                    # sims + exps + masks (f32 / int32)
    return inputs + scaled + temps + (2 << 20)


def _vmem_est_tiled(b, dp, tm, mm_bytes):
    keys = 2 * 2 * b * dp * mm_bytes
    queries = 2 * 2 * tm * dp * mm_bytes
    scaled = 2 * tm * dp * mm_bytes
    temps = 10 * tm * b * 4
    return keys + queries + scaled + temps + (2 << 20)


def _select_tiling(b, dp, mm_bytes, budget, num_tc, block_rows):
    if block_rows is not None:
        tm = int(block_rows)
        assert b % tm == 0, "block_rows must divide the batch size"
        assert tm == b or tm % 8 == 0, "block_rows must be a multiple of 8 (sublane)"
        return tm, tm == b
    if num_tc <= 1 and _vmem_est_dedup(b, dp, mm_bytes) <= budget:
        return b, True                        # 3-matmul single-block path (1 TensorCore)
    # Multi-TC chips (v7x) prefer g >= num_tc so both TensorCores stay busy; single-TC
    # chips only land here when the dedup path exceeds the VMEM budget.  Prefer large
    # tiles (>=256 fills the v6e/v7x MXU M dim, >=128 the v5e MXU).
    for tm in (1024, 512, 256, 128, 64, 32, 16, 8):
        if tm < b and b % tm == 0 and (b // tm) >= num_tc:
            if _vmem_est_tiled(b, dp, tm, mm_bytes) <= budget:
                return tm, False
    # TODO(synk): key-tiled online-logsumexp (a second "arbitrary" grid axis over key
    # columns) would bound VMEM at O(TM*TK) for very large / indivisible batch sizes.
    return b, True


# --------------------------------------------------------------------------- wrapper


def ntxent_loss(out0: jax.Array, out1: jax.Array, temperature: float = 0.5, *,
                matmul_dtype=jnp.bfloat16, block_rows=None) -> jax.Array:
    """NT-Xent / SimCLR contrastive loss (memory bank disabled, single device)."""
    assert out0.shape == out1.shape and out0.ndim == 2
    if abs(temperature) < 1e-8:
        raise ValueError("Illegal temperature: abs({}) < 1e-8".format(temperature))

    b, d = out0.shape
    inv_t = 1.0 / temperature
    # Shift-free exp is safe while exp(|1/t|) stays well inside f32 range.
    use_max_shift = abs(inv_t) > 60.0

    # L2-normalize ONCE in the wrapper (the kernel would otherwise redo the O(B*Dp) key
    # normalization + cast on every grid step) and hand the kernel matmul-dtype (bf16 by
    # default) operands.  Matches torch.nn.functional.normalize (eps = 1e-12).
    f32 = jnp.float32
    x0 = out0.astype(f32)
    x1 = out1.astype(f32)
    n0 = x0 * lax.rsqrt(jnp.maximum(jnp.sum(x0 * x0, axis=-1, keepdims=True), f32(1e-24)))
    n1 = x1 * lax.rsqrt(jnp.maximum(jnp.sum(x1 * x1, axis=-1, keepdims=True), f32(1e-24)))

    dp = max(128, ((d + 127) // 128) * 128)            # lane-aligned embedding dim
    if dp != d:
        pad = ((0, 0), (0, dp - d))
        n0 = jnp.pad(n0, pad)
        n1 = jnp.pad(n1, pad)
    n0 = n0.astype(matmul_dtype)
    n1 = n1.astype(matmul_dtype)

    mm_bytes = jnp.dtype(matmul_dtype).itemsize
    capacity = _vmem_capacity_bytes()
    budget = capacity - max(8 << 20, capacity // 8)    # ~112 MiB v5e/v6e, ~56 MiB v7x
    num_tc = _num_tensorcores()

    tm, dedup = _select_tiling(b, dp, mm_bytes, budget, num_tc, block_rows)
    if use_max_shift:
        dedup = False                # extreme-temperature path: 4-matmul kernel + max shift
    g = b // tm

    compiler_params = pltpu.CompilerParams(
        dimension_semantics=("parallel",),
        vmem_limit_bytes=int(budget),
    )
    out_shape = jax.ShapeDtypeStruct((g, 1, 1), jnp.float32)
    out_specs = pl.BlockSpec((1, 1, 1), lambda i: (i, 0, 0))

    # NOTE: the key BlockSpecs use a constant index_map, so their DMA is only issued once
    # (unchanged block indices are not refetched); the residual double-buffer overhead at
    # bf16 is small.

    if dedup:
        kernel = functools.partial(_ntxent_dedup_kernel, inv_t=float(inv_t))
        cost = pl.CostEstimate(
            flops=2 * 3 * b * b * dp + 6 * b * dp,
            transcendentals=3 * b * b + 2 * b,
            bytes_accessed=2 * b * dp * mm_bytes + 4)
        partials = pl.pallas_call(
            kernel,
            out_shape=out_shape,
            grid=(1,),
            in_specs=[pl.BlockSpec((b, dp), lambda i: (0, 0)),   # out0 (queries == keys)
                      pl.BlockSpec((b, dp), lambda i: (0, 0))],  # out1 (queries == keys)
            out_specs=out_specs,
            compiler_params=compiler_params,
            cost_estimate=cost,
        )(n0, n1)
    else:
        kernel = functools.partial(_ntxent_tiled_kernel, inv_t=float(inv_t),
                                   use_max_shift=use_max_shift)
        cost = pl.CostEstimate(
            flops=2 * 4 * b * b * dp + 6 * b * dp,
            transcendentals=4 * b * b + 4 * b,
            bytes_accessed=4 * b * dp * mm_bytes + 4 * g)
        partials = pl.pallas_call(
            kernel,
            out_shape=out_shape,
            grid=(g,),
            in_specs=[pl.BlockSpec((tm, dp), lambda i: (i, 0)),   # out0 anchor tile
                      pl.BlockSpec((tm, dp), lambda i: (i, 0)),   # out1 anchor tile
                      pl.BlockSpec((b, dp), lambda i: (0, 0)),    # out0 keys (resident)
                      pl.BlockSpec((b, dp), lambda i: (0, 0))],   # out1 keys (resident)
            out_specs=out_specs,
            compiler_params=compiler_params,
            cost_estimate=cost,
        )(n0, n1, n0, n1)

    return jnp.sum(partials) / jnp.float32(2 * b)


# ------------------------------------------------------------------------- reference


def _ntxent_loss_ref(out0, out1, temperature=0.5):
    """Pure-JAX reference mirroring the PyTorch forward (memory_bank_size=0 path)."""
    B = out0.shape[0]
    n0 = out0 / jnp.maximum(jnp.linalg.norm(out0, axis=1, keepdims=True), 1e-12)
    n1 = out1 / jnp.maximum(jnp.linalg.norm(out1, axis=1, keepdims=True), 1e-12)
    l00 = n0 @ n0.T / temperature
    l01 = n0 @ n1.T / temperature
    l10 = n1 @ n0.T / temperature
    l11 = n1 @ n1.T / temperature
    mask = ~jnp.eye(B, dtype=bool)
    l00 = l00[mask].reshape(B, B - 1)
    l11 = l11[mask].reshape(B, B - 1)
    logits = jnp.concatenate(
        [jnp.concatenate([l01, l00], axis=1),
         jnp.concatenate([l10, l11], axis=1)], axis=0)
    labels = jnp.tile(jnp.arange(B), 2)
    lse = jax.scipy.special.logsumexp(logits, axis=1)
    picked = logits[jnp.arange(2 * B), labels]
    return jnp.mean(lse - picked)


if __name__ == "__main__":
    # TODO(synk): memory-bank (MoCo) negatives path and distributed gather path are not
    # implemented; default NTXentLoss(memory_bank_size=0, gather_distributed=False) only.
    key = jax.random.PRNGKey(0)
    k0, k1, k2, k3 = jax.random.split(key, 4)
    B, D = 8, 32
    out0 = jax.random.normal(k0, (B, D), dtype=jnp.float32)
    out1 = jax.random.normal(k1, (B, D), dtype=jnp.float32)

    ref = _ntxent_loss_ref(out0, out1, temperature=0.5)

    # 1) Default path (dedup on 1-TC chips, tiled on v7x), f32 MXU operands: tight check.
    loss_f32 = jax.block_until_ready(
        ntxent_loss(out0, out1, temperature=0.5, matmul_dtype=jnp.float32))
    assert jnp.allclose(loss_f32, ref, rtol=1e-4, atol=1e-4), (loss_f32, ref)

    # 2) Same path with the default bf16 MXU operands: loose check.
    loss_bf16 = jax.block_until_ready(ntxent_loss(out0, out1, temperature=0.5))
    assert jnp.allclose(loss_bf16, ref, rtol=5e-2, atol=5e-2), (loss_bf16, ref)

    # 3) Row-tiled grid path (grid=2, 8-row anchor tiles), f32: tight check.
    B2 = 16
    a0 = jax.random.normal(k2, (B2, D), dtype=jnp.float32)
    a1 = jax.random.normal(k3, (B2, D), dtype=jnp.float32)
    ref2 = _ntxent_loss_ref(a0, a1, temperature=0.5)
    loss_tiled = jax.block_until_ready(
        ntxent_loss(a0, a1, temperature=0.5, matmul_dtype=jnp.float32, block_rows=8))
    assert jnp.allclose(loss_tiled, ref2, rtol=1e-4, atol=1e-4), (loss_tiled, ref2)

    print("KERNEL_OK")
</pallas_src>

<mosaic_0001>
module attributes {stable_mosaic.version = 11 : i64} {
  func.func @_ntxent_dedup_kernel(%arg0: i32, %arg1: memref<8x128xf32, #tpu.memory_space<vmem>>, %arg2: memref<8x128xf32, #tpu.memory_space<vmem>>, %arg3: memref<1x1x1xf32, #tpu.memory_space<vmem>>) attributes {dimension_semantics = [#tpu.dimension_semantics<parallel>], iteration_bounds = array<i64: 1>, scalar_prefetch = 0 : i64, scratch_operands = 0 : i64, tpu.core_type = #tpu.core_type<tc>, window_params = [{pipeline_mode = #tpu.pipeline_mode<synchronous>, transform_indices = @transform_0, window_bounds = array<i64: 8, 128>}, {pipeline_mode = #tpu.pipeline_mode<synchronous>, transform_indices = @transform_1, window_bounds = array<i64: 8, 128>}, {transform_indices = @transform_2, window_bounds = array<i64: 1, 1, 1>}]} {
    %c0 = arith.constant 0 : index
    %c0_0 = arith.constant 0 : index
    %0 = vector.load %arg1[%c0, %c0_0] : memref<8x128xf32, #tpu.memory_space<vmem>>, vector<8x128xf32>
    %c0_1 = arith.constant 0 : index
    %c0_2 = arith.constant 0 : index
    %1 = vector.load %arg2[%c0_1, %c0_2] : memref<8x128xf32, #tpu.memory_space<vmem>>, vector<8x128xf32>
    %cst = arith.constant 2.000000e+00 : f32
    %2 = vector.broadcast %cst : f32 to vector<8x128xf32>
    %3 = arith.mulf %0, %2 : vector<8x128xf32>
    %cst_3 = arith.constant 2.000000e+00 : f32
    %4 = vector.broadcast %cst_3 : f32 to vector<8x128xf32>
    %5 = arith.mulf %1, %4 : vector<8x128xf32>
    %cst_4 = arith.constant dense<0.000000e+00> : vector<8x8xf32>
    %6 = tpu.matmul %3, %1, %cst_4 {dimension_numbers = #tpu.dot_dimension_numbers<[1], [1], [0], [0], [0, 0, 1, 0], [], []>} : vector<8x128xf32>, vector<8x128xf32>, vector<8x8xf32> -> vector<8x8xf32>
    %cst_5 = arith.constant dense<0.000000e+00> : vector<8x8xf32>
    %7 = tpu.matmul %3, %0, %cst_5 {dimension_numbers = #tpu.dot_dimension_numbers<[1], [1], [0], [0], [0, 0, 1, 0], [], []>} : vector<8x128xf32>, vector<8x128xf32>, vector<8x8xf32> -> vector<8x8xf32>
    %cst_6 = arith.constant dense<0.000000e+00> : vector<8x8xf32>
    %8 = tpu.matmul %5, %1, %cst_6 {dimension_numbers = #tpu.dot_dimension_numbers<[1], [1], [0], [0], [0, 0, 1, 0], [], []>} : vector<8x128xf32>, vector<8x128xf32>, vector<8x8xf32> -> vector<8x8xf32>
    %9 = tpu.iota {dimensions = array<i32: 0>} : vector<8x8xi32>
    %10 = tpu.iota {dimensions = array<i32: 1>} : vector<8x8xi32>
    %11 = arith.cmpi eq, %9, %10 : vector<8x8xi32>
    %cst_7 = arith.constant 0.000000e+00 : f32
    %12 = vector.broadcast %cst_7 : f32 to vector<8x8xf32>
    %13 = arith.select %11, %6, %12 : vector<8x8xi1>, vector<8x8xf32>
    %14 = vector.shape_cast %13 : vector<8x8xf32> to vector<1x8x8xf32>
    %cst_8 = arith.constant dense<0.000000e+00> : vector<1xf32>
    %15 = vector.multi_reduction <add>, %14, %cst_8 [1, 2] : vector<1x8x8xf32> to vector<1xf32>
    %16 = vector.shape_cast %15 : vector<1xf32> to vector<1x1x1xf32>
    %17 = vector.extract %16[0, 0, 0] : f32 from vector<1x1x1xf32>
    %18 = vector.broadcast %17 : f32 to vector<1x1xf32>
    %19 = math.exp %6 : vector<8x8xf32>
    %20 = math.exp %7 : vector<8x8xf32>
    %cst_9 = arith.constant 0.000000e+00 : f32
    %21 = vector.broadcast %cst_9 : f32 to vector<8x8xf32>
    %22 = arith.select %11, %21, %20 : vector<8x8xi1>, vector<8x8xf32>
    %23 = math.exp %8 : vector<8x8xf32>
    %cst_10 = arith.constant 0.000000e+00 : f32
    %24 = vector.broadcast %cst_10 : f32 to vector<8x8xf32>
    %25 = arith.select %11, %24, %23 : vector<8x8xi1>, vector<8x8xf32>
    %cst_11 = arith.constant dense<0.000000e+00> : vector<8xf32>
    %26 = vector.multi_reduction <add>, %19, %cst_11 [1] : vector<8x8xf32> to vector<8xf32>
    %27 = vector.shape_cast %26 : vector<8xf32> to vector<8x1xf32>
    %cst_12 = arith.constant dense<0.000000e+00> : vector<8xf32>
    %28 = vector.multi_reduction <add>, %22, %cst_12 [1] : vector<8x8xf32> to vector<8xf32>
    %29 = vector.shape_cast %28 : vector<8xf32> to vector<8x1xf32>
    %30 = arith.addf %27, %29 : vector<8x1xf32>
    %cst_13 = arith.constant dense<0.000000e+00> : vector<8xf32>
    %31 = vector.multi_reduction <add>, %19, %cst_13 [0] : vector<8x8xf32> to vector<8xf32>
    %32 = vector.shape_cast %31 : vector<8xf32> to vector<1x8xf32>
    %cst_14 = arith.constant dense<0.000000e+00> : vector<8xf32>
    %33 = vector.multi_reduction <add>, %25, %cst_14 [0] : vector<8x8xf32> to vector<8xf32>
    %34 = vector.shape_cast %33 : vector<8xf32> to vector<1x8xf32>
    %35 = arith.addf %32, %34 : vector<1x8xf32>
    %36 = math.log %30 : vector<8x1xf32>
    %37 = vector.shape_cast %36 : vector<8x1xf32> to vector<1x8x1xf32>
    %cst_15 = arith.constant dense<0.000000e+00> : vector<1xf32>
    %38 = vector.multi_reduction <add>, %37, %cst_15 [1, 2] : vector<1x8x1xf32> to vector<1xf32>
    %39 = vector.shape_cast %38 : vector<1xf32> to vector<1x1x1xf32>
    %40 = vector.extract %39[0, 0, 0] : f32 from vector<1x1x1xf32>
    %41 = vector.broadcast %40 : f32 to vector<1x1xf32>
    %42 = math.log %35 : vector<1x8xf32>
    %43 = vector.shape_cast %42 : vector<1x8xf32> to vector<1x1x8xf32>
    %cst_16 = arith.constant dense<0.000000e+00> : vector<1xf32>
    %44 = vector.multi_reduction <add>, %43, %cst_16 [1, 2] : vector<1x1x8xf32> to vector<1xf32>
    %45 = vector.shape_cast %44 : vector<1xf32> to vector<1x1x1xf32>
    %46 = vector.extract %45[0, 0, 0] : f32 from vector<1x1x1xf32>
    %47 = vector.broadcast %46 : f32 to vector<1x1xf32>
    %48 = arith.addf %41, %47 : vector<1x1xf32>
    %cst_17 = arith.constant 2.000000e+00 : f32
    %49 = vector.broadcast %cst_17 : f32 to vector<1x1xf32>
    %50 = arith.mulf %49, %18 : vector<1x1xf32>
    %51 = arith.subf %48, %50 : vector<1x1xf32>
    %c0_18 = arith.constant 0 : index
    %c0_19 = arith.constant 0 : index
    %c0_20 = arith.constant 0 : index
    %52 = vector.load %arg3[%c0_18, %c0_19, %c0_20] : memref<1x1x1xf32, #tpu.memory_space<vmem>>, vector<1x1x1xf32>
    %53 = vector.shape_cast %52 : vector<1x1x1xf32> to vector<1x1xf32>
    %54 = vector.shape_cast %51 : vector<1x1xf32> to vector<1x1x1xf32>
    tpu.vector_store %arg3[%c0_18, %c0_19, %c0_20], %54 {strides = array<i32>} : memref<1x1x1xf32, #tpu.memory_space<vmem>>, vector<1x1x1xf32>,
    return
  }
  func.func @transform_0(%arg0: i32) -> (i32, i32) {
    %c0_i32 = arith.constant 0 : i32
    %c0_i32_0 = arith.constant 0 : i32
    %c0_i32_1 = arith.constant 0 : i32
    return %c0_i32, %c0_i32_0 : i32, i32
  }
  func.func @transform_1(%arg0: i32) -> (i32, i32) {
    %c0_i32 = arith.constant 0 : i32
    %c0_i32_0 = arith.constant 0 : i32
    %c0_i32_1 = arith.constant 0 : i32
    return %c0_i32, %c0_i32_0 : i32, i32
  }
  func.func @transform_2(%arg0: i32) -> (i32, i32, i32) {
    %c0_i32 = arith.constant 0 : i32
    %c0_i32_0 = arith.constant 0 : i32
    %c0_i32_1 = arith.constant 0 : i32
    return %arg0, %c0_i32, %c0_i32_0 : i32, i32, i32
  }
}

</mosaic_0001>

<bundles_post_ra>
// kernel: tpu_custom_call.1
= control target key start
LH: loop header
LB: loop body
LE: loop exit
PB: predicated region body
PF: predicated region fallthrough
CT: control target
= control target key end

     0   :  { %7 = vsyncpa [#allocation3], 0  ;;  %s523_s0 = inlined_call_operand.hbm [shape: f32[8,128], index: 0, kind: input, shape index: {}]   ;;  %s524_s1 = inlined_call_operand.hbm [shape: f32[8,128], index: 1, kind: input, shape index: {}]   ;;  %s525_s2 = inlined_call_operand.hbm [shape: f32[1,1,1], index: 2, kind: output, shape index: {}]  }
   0x1   :  { %8 = vsyncpa [#allocation6], 0 }
   0x2   :  { %9 = vsyncpa [#allocation4], 0  ;;  %s460_s9 = smov [#allocation2]   ;;  %s461_s11 = smov [#allocation5]  }
   0x3   :  { %s16_s10 = sshll.u32 %s460_s9, 4  ;;  %s26_s12 = sshll.u32 %s461_s11, 4  ;;  %s17_s10 = int_to_ptr.vmem [resolvable:$true] %s16_s10  ;;  %s27_s12 = int_to_ptr.vmem [resolvable:$true] %s26_s12 }
   0x4   :  { %s388_s15 = scalar_lea.hbm %s523_s0, 128 }
   0x5   :  { %p389_p0 = scmp.ne.s32.totalorder %s523_s0, %s388_s15  ;;  %p392_p1 = scmp.lt.u32.totalorder %s388_s15, %s523_s0 }
   0x7   :  { %p394_p2 = pnand %p392_p1, %p389_p0 }
   0x9   :  { %397 = shalt.err (!%p394_p2)
}
   0xa   :  { %s398_s20 = scalar_lea.vmem %s17_s10, 128  ;;  %p403_p4 = scmp.lt.s32.totalorder %s17_s10, %s17_s10 }
   0xb   :  { %p399_p3 = scmp.ne.s32.totalorder %s17_s10, %s398_s20  ;;  %p404_p5 = scmp.lt.s32.totalorder %s398_s20, %s398_s20 }
   0xd   :  { %p405_p6 = por %p404_p5, %p403_p4 }
   0xf   :  { %p406_p7 = pnand %p405_p6, %p399_p3 }
  0x11   :  { %409 = shalt.err (!%p406_p7)
}
  0x12   :  { %19 = dma.hbm_to_vmem [thread:$0]  %s523_s0, 128, %s17_s10, [#allocation3]  }
  0x13   :  { %s410_s25 = scalar_lea.hbm %s524_s1, 128 }
  0x14   :  { %p411_p8 = scmp.ne.s32.totalorder %s524_s1, %s410_s25  ;;  %p414_p9 = scmp.lt.u32.totalorder %s410_s25, %s524_s1 }
  0x16   :  { %p416_p10 = pnand %p414_p9, %p411_p8 }
  0x18   :  { %419 = shalt.err (!%p416_p10)
}
  0x19   :  { %s420_s30 = scalar_lea.vmem %s27_s12, 128  ;;  %p425_p12 = scmp.lt.s32.totalorder %s27_s12, %s27_s12 }
  0x1a   :  { %p421_p11 = scmp.ne.s32.totalorder %s27_s12, %s420_s30  ;;  %p426_p13 = scmp.lt.s32.totalorder %s420_s30, %s420_s30 }
  0x1c   :  { %p427_p0 = por %p426_p13, %p425_p12 }
  0x1e   :  { %p428_p1 = pnand %p427_p0, %p421_p11 }
  0x20   :  { %431 = shalt.err (!%p428_p1)
}
  0x21   :  { %29 = dma.hbm_to_vmem [thread:$0]  %s524_s1, 128, %s27_s12, [#allocation6]  }
  0x22   :  { %454 = dma.done.wait [#allocation3], 128  }
  0x23   :  { %455 = vsyncadd [#allocation3], 4294967168 }
  0x24   :  { %456 = dma.done.wait [#allocation6], 128  }
  0x25   :  { %457 = vsyncadd [#allocation6], 4294967168  ;;  %v462_v0 = vmov 0.0   ;;  %vm463_vm0 = vmmov 0   ;;  %v37_v1 = vld [vmem:[#allocation5] sm:$0xff]  ;;  %v36_v2 = vld [vmem:[#allocation2] sm:$0xff]  ;;  %v250_v5 = vlaneseq }
  0x26   :  { %352 = vmatprep.subr.mxu0 %v462_v0  ;;  %357 = vmatprep.subr.mxu1 %v462_v0  ;;  %v38_v3 = vmul.f32 2.0, %v36_v2  ;;  %v39_v4 = vmul.f32 2.0, %v37_v1  ;;  %vm256_vm2 = vcmask 64512   ;;  %vm313_vm3 = vcmask 57344   ;;  %s464_s6 = smov [#allocation7]  }
  0x27   :  { %354 = vmatprep.mubr.msk.f32.mxu0 %vm463_vm0, %v462_v0  ;;  %359 = vmatprep.mubr.msk.f32.mxu1 %vm463_vm0, %v462_v0  ;;  %v251_v6 = vshrl.u32 %v250_v5, 7  ;;  %v253_v7 = vand.u32 127, %v250_v5  ;;  %vm299_vm4 = vcmask 7168   ;;  %s336_s7 = sshll.u32 %s464_s6, 4  ;;  %vm328_vm5 = vcmask 0   ;;  %s337_s7 = int_to_ptr.vmem [resolvable:$true] %s336_s7 }
  0x28   :  { %353 = vmatpush3.xpose.msra.mxu0 %v37_v1  ;;  %358 = vmatpush3.xpose.msra.mxu1 %v36_v2  ;;  %s432_s8 = scalar_lea.vmem %s337_s7, 16  ;;  %s436_s9 = scalar_lea.vmem %s337_s7, 32 }
  0x29   :  { %362 = vmatprep.subr.mxu0 %v462_v0  ;;  %vm254_vm1 = vcmp.eq.s32.totalorder %v251_v6, %v253_v7  ;;  %p433_p2 = scmp.ne.s32.totalorder %s337_s7, %s432_s8  ;;  %p437_p3 = scmp.lt.s32.totalorder %s337_s7, %s337_s7 }
  0x2a   :  { %p438_p4 = scmp.lt.s32.totalorder %s436_s9, %s432_s8 }
  0x2b   :  { %355 = vmatmul.mubr.f32.vlgmr.msra.gmra.mrb[0].mxu0 %v38_v3  ;;  %360 = vmatmul.mubr.f32.vlgmr.msra.gmra.mrb[0].mxu1 %v38_v3 }
  0x2c   :  { %363 = vmatpush3.xpose.msra.mxu0 %v37_v1  ;;  %364 = vmatprep.mubr.msk.f32.mxu0 %vm463_vm0, %v462_v0  ;;  %p439_p5 = por %p438_p4, %p437_p3 }
  0x2e   :  { %p440_p6 = pnand %p439_p5, %p433_p2 }
  0x2f   :  { %365 = vmatmul.mubr.f32.vlgmr.msra.gmra.mrb[2].mxu0 %v39_v4 }
  0xfe   :  { %v106_v8 = vpop.f32.mrb[0].mxu0  ;;  %v176_v9 = vpop.f32.mrb[0].mxu1 }
  0xff   :  { %v268_v10 = vmul.f32 1.442695, %v106_v8  ;;  %v356_v11 = vpop.f32.mrb[1].mxu0  ;;  %v270_v12 = vmul.f32 1.442695, %v176_v9  ;;  %v361_v13 = vpop.f32.mrb[1].mxu1 }
 0x100   :  { %v255_v14 = vsel %vm254_vm1, %v106_v8, 0.0 }
 0x101   :  { %378 = vpow2.f32 %v268_v10  ;;  %v257_v15 = vsel %vm256_vm2, %v255_v14, 0.0 }
 0x102   :  { %380 = vpow2.f32 %v270_v12  ;;  %258 = vadd.xlane.f32.xlu1 %v257_v15  ;;  %v246_v16 = vpop.f32.mrb[2].mxu0 }
 0x103   :  { %v273_v17 = vmul.f32 1.442695, %v246_v16  ;;  %v366_v18 = vpop.f32.mrb[3].mxu0 }
 0x105   :  { %382 = vpow2.f32 %v273_v17 }
 0x10b   :  { %v379_v19 = vpop.eup %378 }
 0x10c   :  { %v381_v20 = vpop.eup %380  ;;  %v276_v21 = vsel %vm256_vm2, %v379_v19, 0.0 }
 0x10d   :  { %277 = vadd.xlane.f32.xlu0 %v276_v21  ;;  %v283_v22 = vrot.slane %v276_v21, 4  ;;  %v272_v23 = vsel %vm254_vm1, 0.0, %v381_v20 }
 0x10e   :  { %v279_v24 = vsel %vm256_vm2, %v272_v23, 0.0 }
 0x10f   :  { %v383_v25 = vpop.eup %382  ;;  %v284_v26 = vadd.f32 %v283_v22, %v276_v21 }
 0x110   :  { %v275_v27 = vsel %vm254_vm1, 0.0, %v383_v25 }
 0x111   :  { %v285_v28 = vrot.slane %v284_v26, 2  ;;  %280 = vadd.xlane.f32.xlu0 %v279_v24  ;;  %v289_v29 = vsel %vm256_vm2, %v275_v27, 0.0 }
 0x112   :  { %v290_v30 = vrot.slane %v289_v29, 4 }
 0x113   :  { %v286_v31 = vadd.f32 %v285_v28, %v284_v26 }
 0x114   :  { %v291_v32 = vadd.f32 %v290_v30, %v289_v29 }
 0x115   :  { %v287_v34 = vrot.slane %v286_v31, 1 }
 0x116   :  { %v292_v33 = vrot.slane %v291_v32, 2 }
 0x117   :  { %v288_v37 = vadd.f32 %v287_v34, %v286_v31 }
 0x118   :  { %v293_v35 = vadd.f32 %v292_v33, %v291_v32 }
 0x11a   :  { %v294_v36 = vrot.slane %v293_v35, 1 }
 0x11c   :  { %v295_v38 = vadd.f32 %v294_v36, %v293_v35 }
 0x11e   :  { %v296_v39 = vadd.f32 %v295_v38, %v288_v37 }
 0x120   :  { %384 = vlog2.f32 %v296_v39 }
 0x12a   :  { %v385_v40 = vpop.eup %384 }
 0x12b   :  { %v312_v41 = vmul.f32 0.6931472, %v385_v40 }
 0x12d   :  { %v314_v42 = vsel %vm313_vm3, %v312_v41, 0.0 }
 0x12e   :  { %315 = vadd.xlane.f32.xlu0 %v314_v42 }
 0x18f   :  { %v259_v43 = vpop.xlane.xlu1 %258 }
 0x190   :  { %v260_v44 = vrot.slane %v259_v43, 4 }
 0x192   :  { %v261_v45 = vadd.f32 %v260_v44, %v259_v43 }
 0x194   :  { %v262_v46 = vrot.slane %v261_v45, 2 }
 0x196   :  { %v263_v47 = vadd.f32 %v262_v46, %v261_v45 }
 0x198   :  { %v264_v48 = vrot.slane %v263_v47, 1 }
 0x19a   :  { %v278_v49 = vpop.xlane.xlu0 %277  ;;  %v265_v50 = vadd.f32 %v264_v48, %v263_v47 }
 0x19c   :  { %367 = vpush %v265_v50 }
 0x19e   :  { %v281_v51 = vpop.xlane.xlu0 %280 }
 0x19f   :  { %v282_v52 = vadd.f32 %v281_v51, %v278_v49 }
 0x1a1   :  { %386 = vlog2.f32 %v282_v52 }
 0x1ab   :  { %v387_v53 = vpop.eup %386 }
 0x1ac   :  { %v298_v54 = vmul.f32 0.6931472, %v387_v53 }
 0x1ae   :  { %v300_v55 = vsel %vm299_vm4, %v298_v54, 0.0 }
 0x1af   :  { %301 = vadd.xlane.f32.xlu1 %v300_v55 }
 0x1bb   :  { %v316_v56 = vpop.xlane.xlu0 %315 }
 0x1bc   :  { %v317_v57 = vrot.slane %v316_v56, 4 }
 0x1be   :  { %v318_v58 = vadd.f32 %v317_v57, %v316_v56 }
 0x1c0   :  { %v319_v59 = vrot.slane %v318_v58, 2 }
 0x1c2   :  { %v320_v63 = vadd.f32 %v319_v59, %v318_v58 }
 0x1c4   :  { %v321_v2 = vrot.slane %v320_v63, 1 }
 0x1c6   :  { %v322_v5 = vadd.f32 %v321_v2, %v320_v63 }
 0x1cd   :  { %s368_s1 = spop %367 }
 0x1ce   :  { %v267_v6 = vstv %s368_s1 }
 0x1cf   :  { %v326_v9 = vmul.f32 2.0, %v267_v6 }
 0x23c   :  { %v302_v60 = vpop.xlane.xlu1 %301 }
 0x23d   :  { %v303_v61 = vrot.slane %v302_v60, 4 }
 0x23f   :  { %v304_v62 = vadd.f32 %v303_v61, %v302_v60 }
 0x241   :  { %v305_v0 = vrot.slane %v304_v62, 2 }
 0x243   :  { %v306_v1 = vadd.f32 %v305_v0, %v304_v62 }
 0x245   :  { %v307_v3 = vrot.slane %v306_v1, 1 }
 0x247   :  { %v308_v4 = vadd.f32 %v307_v3, %v306_v1 }
 0x249   :  { %369 = vpush %v308_v4 }
 0x24a   :  { %371 = vpush %v322_v5 }
 0x27a   :  { %s370_s4 = spop %369 }
 0x27b   :  { %v310_v7 = vstv %s370_s4  ;;  %s372_s5 = spop %371 }
 0x27c   :  { %v324_v8 = vstv %s372_s5 }
 0x27d   :  { %v325_v10 = vadd.f32 %v324_v8, %v310_v7 }
 0x27f   :  { %v327_v11 = vsub.f32 %v325_v10, %v326_v9 }
 0x281   :  { %329 = vst.msk [vmem:[#allocation7] sm:$0x1] %vm328_vm5, %v327_v11 }
 0x282   :  { %443 = shalt.err (!%p440_p6)
}
 0x283   :  { %s444_s12 = scalar_lea.hbm %s525_s2, 16 }
 0x284   :  { %p445_p7 = scmp.ne.s32.totalorder %s525_s2, %s444_s12  ;;  %p448_p8 = scmp.lt.u32.totalorder %s444_s12, %s525_s2 }
 0x286   :  { %p450_p9 = pnand %p448_p8, %p445_p7 }
 0x288   :  { %453 = shalt.err (!%p450_p9)
}
 0x289   :  { %339 = dma.vmem_to_hbm [thread:$0]  %s337_s7, 16, %s525_s2, [#allocation4]  }
 0x28a   :  { %458 = dma.done.wait [#allocation4], 16  }
 0x28b   :  { %459 = vsyncadd [#allocation4], 4294967280 }
 0x28c   :  { %343 = vsyncpa [#allocation3], 1 }
 0x28d   :  { %344 = vsyncpa [#allocation6], 1 }
 0x28e   :  { %345 = vsyncpa [#allocation4], 1 }

</bundles_post_ra>
